<compile_context>
chip_gen: v5e
topology: v5e:2x2
jax: 0.10.0
libtpu: 0.0.40
codegen_flags: <defaults>
</compile_context>

<pallas_src>
import functools

import jax
import jax.numpy as jnp
from jax.experimental import pallas as pl
from jax.experimental.pallas import tpu as pltpu


# ------------------------------ tile selection ------------------------------ #
def _pick_tc(c, block_cols):
    """Channel tile: multiple of 128, <= block_cols, >=2 tiles when C > 128 (v7x megacore)."""
    c_vregs = pl.cdiv(c, 128)
    if c_vregs <= 1:
        return c                                  # full channel dim (may be <128 lanes)
    max_vregs = max(1, block_cols // 128)
    tc_vregs = min(max_vregs, pl.cdiv(c_vregs, 2))  # aim for >= 2 channel tiles
    return 128 * tc_vregs


def _pick_tr(n, block_rows):
    """Row tile: full N if it fits, else a multiple of 16 (bf16 sublane granularity)."""
    if n <= block_rows:
        return n
    return max(16, block_rows - block_rows % 16)


# --------------------------- fused one-pass kernel --------------------------- #
def _fused_kernel(wsum_ref, x_ref, w_ref, g_ref, b_ref, rm_ref, rv_ref,
                  y_ref, stats_ref, *, eps, momentum):
    # grid = (channel_tiles,); the whole row extent is resident in VMEM.
    x = x_ref[...].astype(jnp.float32)                 # (N, TC)
    w = w_ref[...]                                     # (N, 1) f32
    wsum = wsum_ref[0]                                 # scalar sum(w) from SMEM
    inv_w = 1.0 / wsum
    mean = jnp.sum(x * w, axis=0, keepdims=True) * inv_w          # (1, TC)
    d = x - mean
    var_b = jnp.sum(d * d * w, axis=0, keepdims=True) * inv_w     # biased weighted var
    scale = g_ref[...] * jax.lax.rsqrt(var_b + eps)
    y_ref[...] = (d * scale + b_ref[...]).astype(y_ref.dtype)
    # Running stats (var * W/(W-1) exactly as the PyTorch module; unguarded for
    # sum(w) <= 1, matching the reference behavior).
    var_u = var_b * (wsum / (wsum - 1.0))
    nrm = (1.0 - momentum) * rm_ref[...] + momentum * mean
    nrv = (1.0 - momentum) * rv_ref[...] + momentum * var_u
    stats_ref[...] = jnp.concatenate([nrm, nrv], axis=0)          # (2, TC)


# ----------------------- fallback pass 1: statistics ------------------------- #
def _stats_kernel(wsum_ref, x_ref, w_ref, g_ref, b_ref, rm_ref, rv_ref,
                  stats_ref, wx_acc, wx2_acc, *, eps, momentum, n_rows):
    # grid = (channel_tiles, row_tiles); rows (reduction) innermost / "arbitrary".
    i = pl.program_id(1)
    tr = x_ref.shape[0]

    @pl.when(i == 0)
    def _init():
        wx_acc[...] = jnp.zeros_like(wx_acc)
        wx2_acc[...] = jnp.zeros_like(wx2_acc)

    # Mask rows of a (possibly partial) trailing row tile (x is NOT host-padded).
    row = jax.lax.broadcasted_iota(jnp.int32, (tr, 1), 0) + i * tr
    valid = row < n_rows
    x = jnp.where(valid, x_ref[...].astype(jnp.float32), 0.0)     # (TR, TC)
    w = jnp.where(valid, w_ref[...], 0.0)                         # (TR, 1)
    wx = x * w
    wx_acc[...] += jnp.sum(wx, axis=0, keepdims=True)
    wx2_acc[...] += jnp.sum(wx * x, axis=0, keepdims=True)

    @pl.when(i == pl.num_programs(1) - 1)
    def _finalize():
        wsum = wsum_ref[0]
        inv_w = 1.0 / wsum
        mean = wx_acc[...] * inv_w
        var_b = jnp.maximum(wx2_acc[...] * inv_w - mean * mean, 0.0)
        scale = g_ref[...] * jax.lax.rsqrt(var_b + eps)
        shift = b_ref[...] - mean * scale
        var_u = var_b * (wsum / (wsum - 1.0))
        nrm = (1.0 - momentum) * rm_ref[...] + momentum * mean
        nrv = (1.0 - momentum) * rv_ref[...] + momentum * var_u
        stats_ref[...] = jnp.concatenate([scale, shift, nrm, nrv], axis=0)   # (4, TC)


# ------------------------- fallback pass 2: affine ---------------------------- #
def _affine_kernel(x_ref, sr_ref, y_ref):
    x = x_ref[...].astype(jnp.float32)
    y_ref[...] = (x * sr_ref[0:1, :] + sr_ref[1:2, :]).astype(y_ref.dtype)


def _apply_affine(x, sr, block_rows, block_cols, vmem_limit_bytes):
    n, c = x.shape
    tc = _pick_tc(c, block_cols)
    tr = _pick_tr(n, block_rows)
    s = sr.shape[0]
    return pl.pallas_call(
        _affine_kernel,
        grid=(pl.cdiv(n, tr), pl.cdiv(c, tc)),
        in_specs=[pl.BlockSpec((tr, tc), lambda i, j: (i, j)),
                  pl.BlockSpec((s, tc), lambda i, j: (0, j))],
        out_specs=pl.BlockSpec((tr, tc), lambda i, j: (i, j)),
        out_shape=jax.ShapeDtypeStruct((n, c), x.dtype),
        compiler_params=pltpu.CompilerParams(
            dimension_semantics=("parallel", "parallel"),
            vmem_limit_bytes=vmem_limit_bytes),
    )(x, sr)


# ------------------------------ public wrapper ------------------------------- #
def meta_weight_batchnorm1d(x, w, gamma, beta, running_mean, running_var, *,
                            eps=1e-5, momentum=0.1,
                            training=True, test_global=True,
                            block_rows=1024, block_cols=512,
                            fused_vmem_budget_bytes=32 * 1024 * 1024,
                            vmem_limit_bytes=48 * 1024 * 1024):
    """Functional forward of MetaWeightBatchNorm1d.

    Returns (y, new_running_mean, new_running_var); running stats are only
    updated when training=True (mirrors the PyTorch module's in-place EMA).
    y is returned in x.dtype; all math is done in f32 inside the kernels.
    """
    n, c = x.shape
    f32 = jnp.float32
    g2 = gamma.astype(f32).reshape(1, c)
    b2 = beta.astype(f32).reshape(1, c)

    if (not training) and test_global:
        # Eval with global (running) statistics: tiny per-channel fold on the host,
        # then one streaming affine kernel (1 read + 1 write of x).
        rstd = jax.lax.rsqrt(running_var.astype(f32) + eps).reshape(1, c)
        scale = g2 * rstd
        shift = b2 - running_mean.astype(f32).reshape(1, c) * scale
        sr = jnp.concatenate([scale, shift], axis=0)               # (2, C) -- tiny
        y = _apply_affine(x, sr, block_rows, block_cols, vmem_limit_bytes)
        return y, running_mean, running_var

    # Weighted batch statistics (training, or eval with test_gloabel=False).
    w2 = w.astype(f32).reshape(n, 1)
    wsum = jnp.sum(w2).reshape(1)                                  # SMEM scalar
    rm2 = running_mean.astype(f32).reshape(1, c)
    rv2 = running_var.astype(f32).reshape(1, c)
    kern_kwargs = dict(eps=float(eps), momentum=float(momentum))

    tc = _pick_tc(c, block_cols)
    # Fused-path feasibility: 2 in + 2 out pipelined (N, tc) blocks in x.dtype plus
    # ~3 f32 in-kernel temporaries must fit the per-generation VMEM budget.
    per_col = max(1, n * (4 * x.dtype.itemsize + 3 * 4))
    fused_cols = fused_vmem_budget_bytes // per_col
    if c <= 128:
        tc_fused, fused_ok = c, fused_cols >= c
    else:
        cap = (fused_cols // 128) * 128
        tc_fused, fused_ok = min(tc, cap), cap >= 128

    if fused_ok:
        tc = tc_fused
        n_j = pl.cdiv(c, tc)
        y, stats = pl.pallas_call(
            functools.partial(_fused_kernel, **kern_kwargs),
            grid=(n_j,),
            in_specs=[
                pl.BlockSpec(memory_space=pltpu.MemorySpace.SMEM),   # sum(w)
                pl.BlockSpec((n, tc), lambda j: (0, j)),             # x
                pl.BlockSpec((n, 1), lambda j: (0, 0)),              # w
                pl.BlockSpec((1, tc), lambda j: (0, j)),             # gamma
                pl.BlockSpec((1, tc), lambda j: (0, j)),             # beta
                pl.BlockSpec((1, tc), lambda j: (0, j)),             # running_mean
                pl.BlockSpec((1, tc), lambda j: (0, j)),             # running_var
            ],
            out_specs=(pl.BlockSpec((n, tc), lambda j: (0, j)),
                       pl.BlockSpec((2, tc), lambda j: (0, j))),
            out_shape=(jax.ShapeDtypeStruct((n, c), x.dtype),
                       jax.ShapeDtypeStruct((2, c), f32)),
            compiler_params=pltpu.CompilerParams(
                dimension_semantics=("parallel",),
                vmem_limit_bytes=vmem_limit_bytes),
        )(wsum, x, w2, g2, b2, rm2, rv2)
        new_rm, new_rv = stats[0], stats[1]
    else:
        # Two-pass fallback (N too large to keep a full-row block resident).
        tr = _pick_tr(n, block_rows)
        n_i, n_j = pl.cdiv(n, tr), pl.cdiv(c, tc)
        stats4 = pl.pallas_call(
            functools.partial(_stats_kernel, n_rows=n, **kern_kwargs),
            grid=(n_j, n_i),                          # channel tiles outer, rows inner
            in_specs=[
                pl.BlockSpec(memory_space=pltpu.MemorySpace.SMEM),   # sum(w)
                pl.BlockSpec((tr, tc), lambda j, i: (i, j)),         # x
                pl.BlockSpec((tr, 1), lambda j, i: (i, 0)),          # w
                pl.BlockSpec((1, tc), lambda j, i: (0, j)),          # gamma
                pl.BlockSpec((1, tc), lambda j, i: (0, j)),          # beta
                pl.BlockSpec((1, tc), lambda j, i: (0, j)),          # running_mean
                pl.BlockSpec((1, tc), lambda j, i: (0, j)),          # running_var
            ],
            out_specs=pl.BlockSpec((4, tc), lambda j, i: (0, j)),
            out_shape=jax.ShapeDtypeStruct((4, c), f32),             # [scale;shift;rm;rv]
            scratch_shapes=[pltpu.VMEM((1, tc), f32), pltpu.VMEM((1, tc), f32)],
            compiler_params=pltpu.CompilerParams(
                dimension_semantics=("parallel", "arbitrary"),
                vmem_limit_bytes=vmem_limit_bytes),
        )(wsum, x, w2, g2, b2, rm2, rv2)
        y = _apply_affine(x, stats4, block_rows, block_cols, vmem_limit_bytes)
        new_rm, new_rv = stats4[2], stats4[3]

    if training:
        return (y, new_rm.astype(running_mean.dtype), new_rv.astype(running_var.dtype))
    # eval with test_gloabel=False: normalize with batch weighted stats, no EMA update.
    return y, running_mean, running_var


# TODO(synk): the MetaModule parameter plumbing (named_params/update_params/set_param)
# is host-side Python bookkeeping with no kernel equivalent.

if __name__ == "__main__":
    key = jax.random.PRNGKey(0)
    kx, kw, kg, kb, km, kv = jax.random.split(key, 6)

    N, C = 48, 200                      # small, non-128-aligned shapes
    x = jax.random.normal(kx, (N, C), jnp.float32)
    w = jax.random.uniform(kw, (N,), jnp.float32, 0.5, 1.5)
    gamma = jax.random.uniform(kg, (C,), jnp.float32, 0.5, 1.5)
    beta = 0.1 * jax.random.normal(kb, (C,), jnp.float32)
    running_mean = 0.1 * jax.random.normal(km, (C,), jnp.float32)
    running_var = jax.random.uniform(kv, (C,), jnp.float32, 0.5, 1.5)
    eps, momentum = 1e-5, 0.1

    # Pure-JAX reference (mirrors the PyTorch training-mode forward).
    W = jnp.sum(w)
    mean = jnp.sum(w[:, None] * x, axis=0) / W
    var_b = jnp.sum(w[:, None] * (x - mean) ** 2, axis=0) / W
    var_u = var_b * W / (W - 1.0)
    y_ref = gamma * (x - mean) / jnp.sqrt(var_b + eps) + beta
    rm_ref = (1.0 - momentum) * running_mean + momentum * mean
    rv_ref = (1.0 - momentum) * running_var + momentum * var_u
    y_eval_ref = gamma * (x - running_mean) / jnp.sqrt(running_var + eps) + beta

    # 1) Fused single-pass path (default tiling).
    fwd = jax.jit(functools.partial(meta_weight_batchnorm1d,
                                    eps=eps, momentum=momentum, training=True))
    y1, rm1, rv1 = fwd(x, w, gamma, beta, running_mean, running_var)
    jax.block_until_ready((y1, rm1, rv1))
    assert y1.shape == (N, C) and y1.dtype == x.dtype
    assert jnp.allclose(y1, y_ref, atol=1e-4, rtol=1e-4)
    assert jnp.allclose(rm1, rm_ref, atol=1e-4, rtol=1e-4)
    assert jnp.allclose(rv1, rv_ref, atol=1e-4, rtol=1e-4)

    # 2) Forced two-pass fallback (multiple partial row/channel tiles, row mask).
    fwd2 = jax.jit(functools.partial(meta_weight_batchnorm1d,
                                     eps=eps, momentum=momentum, training=True,
                                     block_rows=32, block_cols=128,
                                     fused_vmem_budget_bytes=0))
    y2, rm2_, rv2_ = fwd2(x, w, gamma, beta, running_mean, running_var)
    jax.block_until_ready((y2, rm2_, rv2_))
    assert jnp.allclose(y2, y_ref, atol=1e-4, rtol=1e-4)
    assert jnp.allclose(rm2_, rm_ref, atol=1e-4, rtol=1e-4)
    assert jnp.allclose(rv2_, rv_ref, atol=1e-4, rtol=1e-4)

    # 3) Eval with global running statistics.
    fwd_eval = jax.jit(functools.partial(meta_weight_batchnorm1d,
                                         eps=eps, momentum=momentum,
                                         training=False, test_global=True))
    y3, rm3, rv3 = fwd_eval(x, w, gamma, beta, running_mean, running_var)
    jax.block_until_ready((y3, rm3, rv3))
    assert jnp.allclose(y3, y_eval_ref, atol=1e-4, rtol=1e-4)
    assert jnp.allclose(rm3, running_mean) and jnp.allclose(rv3, running_var)

    print("KERNEL_OK")
</pallas_src>

<mosaic_0001>
module attributes {stable_mosaic.version = 11 : i64} {
  func.func @_fused_kernel(%arg0: i32, %arg1: memref<1xf32, #tpu.memory_space<smem>>, %arg2: memref<48x128xf32, #tpu.memory_space<vmem>>, %arg3: memref<48x1xf32, #tpu.memory_space<vmem>>, %arg4: memref<1x128xf32, #tpu.memory_space<vmem>>, %arg5: memref<1x128xf32, #tpu.memory_space<vmem>>, %arg6: memref<1x128xf32, #tpu.memory_space<vmem>>, %arg7: memref<1x128xf32, #tpu.memory_space<vmem>>, %arg8: memref<48x128xf32, #tpu.memory_space<vmem>>, %arg9: memref<2x128xf32, #tpu.memory_space<vmem>>) attributes {dimension_semantics = [#tpu.dimension_semantics<parallel>], iteration_bounds = array<i64: 2>, scalar_prefetch = 0 : i64, scratch_operands = 0 : i64, tpu.core_type = #tpu.core_type<tc>, window_params = [{transform_indices = @transform_0, window_bounds = array<i64: 1>}, {transform_indices = @transform_1, window_bounds = array<i64: 48, 128>}, {pipeline_mode = #tpu.pipeline_mode<synchronous>, transform_indices = @transform_2, window_bounds = array<i64: 48, 1>}, {transform_indices = @transform_3, window_bounds = array<i64: 1, 128>}, {transform_indices = @transform_4, window_bounds = array<i64: 1, 128>}, {transform_indices = @transform_5, window_bounds = array<i64: 1, 128>}, {transform_indices = @transform_6, window_bounds = array<i64: 1, 128>}, {transform_indices = @transform_7, window_bounds = array<i64: 48, 128>}, {transform_indices = @transform_8, window_bounds = array<i64: 2, 128>}]} {
    %c0 = arith.constant 0 : index
    %c0_0 = arith.constant 0 : index
    %0 = vector.load %arg2[%c0, %c0_0] : memref<48x128xf32, #tpu.memory_space<vmem>>, vector<48x128xf32>
    %c0_1 = arith.constant 0 : index
    %c0_2 = arith.constant 0 : index
    %1 = vector.load %arg3[%c0_1, %c0_2] : memref<48x1xf32, #tpu.memory_space<vmem>>, vector<48x1xf32>
    %c0_3 = arith.constant 0 : index
    %2 = memref.load %arg1[%c0_3] : memref<1xf32, #tpu.memory_space<smem>>
    %cst = arith.constant 1.000000e+00 : f32
    %3 = arith.divf %cst, %2 : f32
    %4 = vector.broadcast %1 : vector<48x1xf32> to vector<48x128xf32>
    %5 = arith.mulf %0, %4 : vector<48x128xf32>
    %cst_4 = arith.constant dense<0.000000e+00> : vector<128xf32>
    %6 = vector.multi_reduction <add>, %5, %cst_4 [0] : vector<48x128xf32> to vector<128xf32>
    %7 = vector.shape_cast %6 : vector<128xf32> to vector<1x128xf32>
    %8 = vector.broadcast %3 : f32 to vector<1x128xf32>
    %9 = arith.mulf %7, %8 : vector<1x128xf32>
    %10 = vector.broadcast %9 : vector<1x128xf32> to vector<48x128xf32>
    %11 = arith.subf %0, %10 : vector<48x128xf32>
    %12 = arith.mulf %11, %11 : vector<48x128xf32>
    %13 = vector.broadcast %1 : vector<48x1xf32> to vector<48x128xf32>
    %14 = arith.mulf %12, %13 : vector<48x128xf32>
    %cst_5 = arith.constant dense<0.000000e+00> : vector<128xf32>
    %15 = vector.multi_reduction <add>, %14, %cst_5 [0] : vector<48x128xf32> to vector<128xf32>
    %16 = vector.shape_cast %15 : vector<128xf32> to vector<1x128xf32>
    %17 = vector.broadcast %3 : f32 to vector<1x128xf32>
    %18 = arith.mulf %16, %17 : vector<1x128xf32>
    %c0_6 = arith.constant 0 : index
    %c0_7 = arith.constant 0 : index
    %19 = vector.load %arg4[%c0_6, %c0_7] : memref<1x128xf32, #tpu.memory_space<vmem>>, vector<1x128xf32>
    %cst_8 = arith.constant 9.99999974E-6 : f32
    %20 = vector.broadcast %cst_8 : f32 to vector<1x128xf32>
    %21 = arith.addf %18, %20 : vector<1x128xf32>
    %22 = math.rsqrt %21 : vector<1x128xf32>
    %23 = arith.mulf %19, %22 : vector<1x128xf32>
    %24 = vector.broadcast %23 : vector<1x128xf32> to vector<48x128xf32>
    %25 = arith.mulf %11, %24 : vector<48x128xf32>
    %c0_9 = arith.constant 0 : index
    %c0_10 = arith.constant 0 : index
    %26 = vector.load %arg5[%c0_9, %c0_10] : memref<1x128xf32, #tpu.memory_space<vmem>>, vector<1x128xf32>
    %27 = vector.broadcast %26 : vector<1x128xf32> to vector<48x128xf32>
    %28 = arith.addf %25, %27 : vector<48x128xf32>
    %c0_11 = arith.constant 0 : index
    %c0_12 = arith.constant 0 : index
    %29 = vector.load %arg8[%c0_11, %c0_12] : memref<48x128xf32, #tpu.memory_space<vmem>>, vector<48x128xf32>
    tpu.vector_store %arg8[%c0_11, %c0_12], %28 {strides = array<i32>} : memref<48x128xf32, #tpu.memory_space<vmem>>, vector<48x128xf32>,
    %cst_13 = arith.constant 1.000000e+00 : f32
    %30 = arith.subf %2, %cst_13 : f32
    %31 = arith.divf %2, %30 : f32
    %32 = vector.broadcast %31 : f32 to vector<1x128xf32>
    %33 = arith.mulf %18, %32 : vector<1x128xf32>
    %c0_14 = arith.constant 0 : index
    %c0_15 = arith.constant 0 : index
    %34 = vector.load %arg6[%c0_14, %c0_15] : memref<1x128xf32, #tpu.memory_space<vmem>>, vector<1x128xf32>
    %cst_16 = arith.constant 0.899999976 : f32
    %35 = vector.broadcast %cst_16 : f32 to vector<1x128xf32>
    %36 = arith.mulf %35, %34 : vector<1x128xf32>
    %cst_17 = arith.constant 1.000000e-01 : f32
    %37 = vector.broadcast %cst_17 : f32 to vector<1x128xf32>
    %38 = arith.mulf %37, %9 : vector<1x128xf32>
    %39 = arith.addf %36, %38 : vector<1x128xf32>
    %c0_18 = arith.constant 0 : index
    %c0_19 = arith.constant 0 : index
    %40 = vector.load %arg7[%c0_18, %c0_19] : memref<1x128xf32, #tpu.memory_space<vmem>>, vector<1x128xf32>
    %cst_20 = arith.constant 0.899999976 : f32
    %41 = vector.broadcast %cst_20 : f32 to vector<1x128xf32>
    %42 = arith.mulf %41, %40 : vector<1x128xf32>
    %cst_21 = arith.constant 1.000000e-01 : f32
    %43 = vector.broadcast %cst_21 : f32 to vector<1x128xf32>
    %44 = arith.mulf %43, %33 : vector<1x128xf32>
    %45 = arith.addf %42, %44 : vector<1x128xf32>
    %46 = tpu.concatenate %39, %45 in 0 : vector<1x128xf32>, vector<1x128xf32> -> vector<2x128xf32>
    %c0_22 = arith.constant 0 : index
    %c0_23 = arith.constant 0 : index
    %47 = vector.load %arg9[%c0_22, %c0_23] : memref<2x128xf32, #tpu.memory_space<vmem>>, vector<2x128xf32>
    tpu.vector_store %arg9[%c0_22, %c0_23], %46 {strides = array<i32>} : memref<2x128xf32, #tpu.memory_space<vmem>>, vector<2x128xf32>,
    return
  }
  func.func @transform_0(%arg0: i32) -> i32 {
    %c0_i32 = arith.constant 0 : i32
    %c0_i32_0 = arith.constant 0 : i32
    return %c0_i32 : i32
  }
  func.func @transform_1(%arg0: i32) -> (i32, i32) {
    %c0_i32 = arith.constant 0 : i32
    %c0_i32_0 = arith.constant 0 : i32
    return %c0_i32, %arg0 : i32, i32
  }
  func.func @transform_2(%arg0: i32) -> (i32, i32) {
    %c0_i32 = arith.constant 0 : i32
    %c0_i32_0 = arith.constant 0 : i32
    %c0_i32_1 = arith.constant 0 : i32
    return %c0_i32, %c0_i32_0 : i32, i32
  }
  func.func @transform_3(%arg0: i32) -> (i32, i32) {
    %c0_i32 = arith.constant 0 : i32
    %c0_i32_0 = arith.constant 0 : i32
    return %c0_i32, %arg0 : i32, i32
  }
  func.func @transform_4(%arg0: i32) -> (i32, i32) {
    %c0_i32 = arith.constant 0 : i32
    %c0_i32_0 = arith.constant 0 : i32
    return %c0_i32, %arg0 : i32, i32
  }
  func.func @transform_5(%arg0: i32) -> (i32, i32) {
    %c0_i32 = arith.constant 0 : i32
    %c0_i32_0 = arith.constant 0 : i32
    return %c0_i32, %arg0 : i32, i32
  }
  func.func @transform_6(%arg0: i32) -> (i32, i32) {
    %c0_i32 = arith.constant 0 : i32
    %c0_i32_0 = arith.constant 0 : i32
    return %c0_i32, %arg0 : i32, i32
  }
  func.func @transform_7(%arg0: i32) -> (i32, i32) {
    %c0_i32 = arith.constant 0 : i32
    %c0_i32_0 = arith.constant 0 : i32
    return %c0_i32, %arg0 : i32, i32
  }
  func.func @transform_8(%arg0: i32) -> (i32, i32) {
    %c0_i32 = arith.constant 0 : i32
    %c0_i32_0 = arith.constant 0 : i32
    return %c0_i32, %arg0 : i32, i32
  }
}

</mosaic_0001>

<bundles_post_ra>
// kernel: meta_weight_batchnorm1d.1
= control target key start
LH: loop header
LB: loop body
LE: loop exit
PB: predicated region body
PF: predicated region fallthrough
CT: control target
= control target key end

     0   :  { %s1176_s0 = inlined_call_operand.<no memory space> [shape: f32[1], index: 0, kind: input, shape index: {}]   ;;  %s1177_s1 = inlined_call_operand.hbm [shape: f32[48,200], index: 1, kind: input, shape index: {}]   ;;  %s1178_s2 = inlined_call_operand.vmem [shape: f32[48,1], index: 2, kind: input, shape index: {}]   ;;  %s1179_s3 = inlined_call_operand.vmem [shape: f32[1,200], index: 3, kind: input, shape index: {}]   ;;  %s1180_s4 = inlined_call_operand.vmem [shape: f32[1,200], index: 4, kind: input, shape index: {}]   ;;  %s1181_s5 = inlined_call_operand.vmem [shape: f32[1,200], index: 5, kind: input, shape index: {}]   ;;  %s1182_s6 = inlined_call_operand.vmem [shape: f32[1,200], index: 6, kind: input, shape index: {}]   ;;  %s1183_s7 = inlined_call_operand.hbm [shape: f32[48,200], index: 7, kind: output, shape index: {0}]   ;;  %s1184_s8 = inlined_call_operand.vmem [shape: f32[2,200], index: 8, kind: output, shape index: {1}]  }
   0x1   :  { %14 = sst [smem:[#allocation2]] %s1176_s0 }
   0x2   :  { %15 = vsyncpa [#allocation4], 0 }
   0x3   :  { %17 = vsyncpa [#allocation4 + $0x1], 0 }
   0x4   :  { %18 = vsyncpa [#allocation5], 0 }
   0x5   :  { %20 = vsyncpa [#allocation5 + $0x1], 0  ;;  %s960_s29 = smov 0   ;;  %s962_s30 = smov 0  }
   0x6   :  { %s964_s9 = smov 0   ;;  %s966_s10 = smov 0  }
   0x7 LB: > { %s981_s0 = sadd.s32 4294967295, %s903_s10   ;;  %s728_s11 = sadd.s32 4294967294, %s903_s10   ;;  %s903_s10 = sphi %s966_s10, %s1194_s10   ;;  %s899_s9 = sphi %s964_s9, %s1193_s9   ;;  %s895_s30 = sphi %s962_s30, %s1192_s30   ;;  %s891_s29 = sphi %s960_s29, %s1191_s29  }
   0x8   : > { %s985_s12 = sadd.s32 1, %s903_s10   ;;  %s54_s13 = sadd.s32 1, %s899_s9 }
   0x9   : > { %s51_s14 = ssub.s32 %s903_s10, %s985_s12  ;;  %p61_p0 = scmp.ne.s32.totalorder %s899_s9, %s895_s30 }
   0xa   : > { %p52_p1 = scmp.eq.s32.totalorder %s51_s14, 0  ;;  %p62_p2 = scmp.eq.s32.totalorder %s903_s10, 0 }
   0xb   : > { %p67_p3 = scmp.ne.s32.totalorder %s895_s30, %s891_s29  ;;  %p68_p4 = scmp.eq.s32.totalorder %s981_s0, 0 }
   0xc   : > { %s997_s15 = scalar_select %p52_p1, %s899_s9, %s54_s13  }
   0xd   : > { %p63_p5 = por %p62_p2, %p61_p0  ;;  %p999_p6 = por %p68_p4, %p67_p3 }
   0xe   : > { %1185 = sst [smem:[#allocation9_spill]] %s997_s15  ;;  %p216_p7 = scmp.eq.s32.totalorder %s981_s0, 1 }
   0xf   : > { %p222_p8 = scmp.eq.s32.totalorder %s728_s11, 1  ;;  %p730_p9 = scmp.ge.s32.totalorder %s903_s10, 2 }
  0x10   : > { %p756_p10 = scmp.lt.s32.totalorder %s903_s10, 2  ;;  %p1006_p11 = por %p216_p7, %p61_p0 }
  0x11   : > { %p1010_p12 = por %p222_p8, %p67_p3  ;;  %s274_s19 = sand.u32 1, %s899_s9  }
  0x12   : > { %s731_s20 = sshll.u32 %s903_s10, 3  ;;  %s738_s21 = smul.u32 48, %s274_s19 }
  0x13   : > { %s282_s24 = scalar_lea.hbm %s1177_s1, %s731_s20  ;;  %p1019_p13 = pnand %p756_p10, %p63_p5 }
  0x14   : > { %s283_s26 = sshll.u32 %s282_s24, 4  ;;  %s278_s27 = scalar_lea.vmem [#allocation3], %s738_s21  ;;  %s284_s26 = int_to_ptr.hbm [resolvable:$true] %s283_s26 }
  0x15   : > { %s285_s28 = sshll.u32 %s278_s27, 4  ;;  %p732_p0 = scmp.ge.s32.totalorder %s903_s10, 1  ;;  %s286_s28 = int_to_ptr.vmem [resolvable:$true] %s285_s28 }
  0x16   : > { %s275_s11 = scalar_lea.sflag [#allocation4], %s274_s19  ;;  %s807_s13 = sshra.s32 %s284_s26, 4  ;;  %s808_s13 = int_to_ptr.hbm [resolvable:$true] %s807_s13 }
  0x17   : > { %s809_s14 = scalar_lea.hbm %s808_s13, 48  ;;  %p811_p2 = pneg %p1019_p13 }
  0x18   : > { %p810_p1 = scmp.ne.s32.totalorder %s808_s13, %s809_s14  ;;  %s814_s23 = scalar_lea.hbm %s1177_s1, 96 }
  0x19   : > { %p815_p5 = scmp.lt.s32.totalorder %s808_s13, %s1177_s1  ;;  %p816_p7 = scmp.lt.s32.totalorder %s814_s23, %s809_s14 }
  0x1a   : > { %p812_p3 = pnand %p811_p2, %p810_p1 }
  0x1b   : > { %p817_p8 = por %p816_p7, %p815_p5 }
  0x1c   : > { %p813_p4 = pneg %p812_p3 }
  0x1e   : > { %p818_p10 = pnand %p817_p8, %p813_p4 }
  0x20   : > { %821 = shalt.err (!%p818_p10)
}
  0x21   : > { %s905_s19 = smov 256   ;;  %s906_s21 = smov 128  }
  0x22   : > { %s907_s27 = smov 8   ;;  %p317_p1 = scmp.lt.s32.totalorder %s903_s10, 3 }
  0x23   : > { %751 = dma.hbm_to_vmem [thread:$0]  (!%p1019_p13), %s284_s26, 768, %s286_s28, %s275_s11, %s905_s19, %s906_s21, %s907_s27  }
  0x24   : > { %p318_p2 = pnand %p732_p0, %p317_p1 }
  0x25   : > { %s1038_s15 = sand.u32 (!%p318_p2), 1, %s895_s30  }
  0x26   : > { %321 = sbr.rel (%p318_p2) target bundleno = 264 (0x108), region = 48  ;;  %s324_s14 = scalar_lea.sflag (!%p318_p2), [#allocation4], %s1038_s15 }
  0x27   : > { %s739_s13 = smul.u32 (!%p318_p2), 48, %s1038_s15 }
  0x29   : > { %s1044_s20 = scalar_lea.vmem (!%p318_p2), [#allocation3], %s739_s13 }
  0x2b   : > { %882 = dma.done.wait (%p999_p6), %s324_s14, 768  }
  0x2c   : > { %884 = vsyncadd (%p999_p6), %s324_s14, 4294966528  ;;  %v908_v0 = vmov 0   ;;  %s1050_s25 = sld [smem:[#allocation2]]  ;;  %v401_v1 = vld [vmem:[%s1178_s2 + $0x10] sm:$0xff]  ;;  %v399_v2 = vld [vmem:[%s1178_s2] sm:$0xff]  ;;  %p377_p6 = scmp.lt.s32.totalorder %s981_s0, 1 }
  0x2d   : > { %798 = vset.pattern.permute.xlu1 %v908_v0  ;;  %797 = vset.pattern.permute.xlu0 %v908_v0  ;;  %v403_v4 = vld [vmem:[%s1178_s2 + $0x20] sm:$0xff]  ;;  %v402_v5 = vld [vmem:[%s1178_s2 + $0x18] sm:$0xff]  ;;  %v400_v6 = vld [vmem:[%s1178_s2 + $0x8] sm:$0xff]  ;;  %vm570_vm8 = vcmask 1040384  }
  0x2e   : > { %799 = vset.pattern.permute.xlu2 %v908_v0  ;;  %434 = vperm.xlu1 %798, %v401_v1   ;;  %s1070_s14 = scalar_select %p377_p6, %s981_s0, 1  ;;  %v404_v8 = vld [vmem:[%s1178_s2 + $0x28] sm:$0xff]  ;;  %v393_v32 = vld [vmem:[%s1044_s20] sm:$0xff]  ;;  %v395_v34 = vld [vmem:[%s1044_s20 + $0x10] sm:$0xff] }
  0x2f   : > { %424 = vperm.xlu0 %797, %v399_v2   ;;  %444 = vperm.xlu2 %799, %v403_v4   ;;  %v394_v33 = vld [vmem:[%s1044_s20 + $0x8] sm:$0xff]  ;;  %v396_v39 = vld [vmem:[%s1044_s20 + $0x18] sm:$0xff]  ;;  %v397_v42 = vld [vmem:[%s1044_s20 + $0x20] sm:$0xff] }
  0x30   : > { %s382_s16 = scalar_lea.vmem %s1180_s4, %s1070_s14  ;;  %v398_v46 = vld [vmem:[%s1044_s20 + $0x28] sm:$0xff]  ;;  %s388_s26 = scalar_lea.vmem %s1182_s6, %s1070_s14 }
  0x31   : > { %s385_s22 = scalar_lea.vmem %s1181_s5, %s1070_s14  ;;  %s379_s27 = scalar_lea.vmem %s1179_s3, %s1070_s14 }
  0x32   : > { %v406_v3 = vstv %s1050_s25  ;;  %s734_s23 = sadd.f32 -1.0, %s1050_s25 }
  0x33   : > { %801 = vrcp.f32 %v406_v3  ;;  %v418_v10 = vand.u32 2147483648, %v406_v3  ;;  %vm412_vm0 = vweird.f32 %v406_v3  ;;  %v416_v12 = vand.u32 2147483647, %v406_v3 }
  0x34   : > { %v540_v18 = vstv %s734_s23 }
  0x35   : > { %v419_v14 = vor.u32 1.1754944e-38, %v418_v10  ;;  %vm417_vm3 = vcmp.eq.f32.partialorder %v416_v12, 8.507059e+37  ;;  %803 = vrcp.f32 %v540_v18  ;;  %v552_v23 = vand.u32 2147483648, %v540_v18 }
  0x36   : > { %439 = vperm.xlu1 %798, %v402_v5   ;;  %vm546_vm4 = vweird.f32 %v540_v18  ;;  %v550_v25 = vand.u32 2147483647, %v540_v18 }
  0x37   : > { %429 = vperm.xlu0 %797, %v400_v6   ;;  %449 = vperm.xlu2 %799, %v404_v8   ;;  %v553_v26 = vor.u32 1.1754944e-38, %v552_v23 }
  0x38   : > { %vm551_vm7 = vcmp.eq.f32.partialorder %v550_v25, 8.507059e+37 }
  0x39   : > { %v802_v7 = vpop.eup %801 }
  0x3a   : > { %v408_v9 = vmul.f32 %v802_v7, %v406_v3  ;;  %vm413_vm1 = vweird.f32 %v802_v7 }
  0x3b   : > { %vm414_vm2 = vmor %vm412_vm0, %vm413_vm1  ;;  %v804_v19 = vpop.eup %803 }
  0x3c   : > { %v409_v11 = vsub.f32 1.0, %v408_v9  ;;  %v542_v20 = vmul.f32 %v804_v19, %v540_v18  ;;  %vm547_vm5 = vweird.f32 %v804_v19 }
  0x3d   : > { %vm548_vm6 = vmor %vm546_vm4, %vm547_vm5 }
  0x3e   : > { %v410_v13 = vmul.f32 %v802_v7, %v409_v11  ;;  %v543_v21 = vsub.f32 1.0, %v542_v20 }
  0x40   : > { %v411_v15 = vadd.f32 %v802_v7, %v410_v13  ;;  %v544_v22 = vmul.f32 %v804_v19, %v543_v21 }
  0x42   : > { %v415_v16 = vsel %vm414_vm2, %v802_v7, %v411_v15  ;;  %v545_v24 = vadd.f32 %v804_v19, %v544_v22 }
  0x43   : > { %v420_v17 = vsel %vm417_vm3, %v419_v14, %v415_v16 }
  0x44   : > { %740 = vpush %v420_v17  ;;  %v549_v27 = vsel %vm548_vm6, %v804_v19, %v545_v24 }
  0x45   : > { %v554_v28 = vsel %vm551_vm7, %v553_v26, %v549_v27  ;;  %v563_v26 = vld [vmem:[%s388_s26] sm:$0x1]  ;;  %s735_s26 = sshll.u32 %s981_s0, 3  ;;  %s370_s0 = scalar_lea.vmem [#allocation6], %s739_s13 }
  0x46   : > { %742 = vpush %v554_v28  ;;  %v559_v28 = vld [vmem:[%s385_s22] sm:$0x1]  ;;  %s588_s23 = scalar_lea.hbm %s1183_s7, %s735_s26 }
  0x75   : > { %s1086_s24 = spop %740 }
  0x76   : > { %v469_v57 = vstv %s1086_s24  ;;  %s574_s24 = scalar_lea.sflag [#allocation5], %s1038_s15 }
  0x77   : > { %s743_s20 = spop %742 }
  0x78   : > { %s556_s19 = smul.f32 %s743_s20, %s1050_s25  ;;  %s733_s25 = sshll.u32 %s1070_s14, 1 }
  0x79   : > { %s392_s20 = scalar_lea.vmem %s1184_s8, %s733_s25  ;;  %s589_s14 = sshll.u32 %s370_s0, 4  ;;  %s590_s14 = int_to_ptr.vmem [resolvable:$true] %s589_s14 }
  0x7a   : > { %v557_v25 = vstv %s556_s19 }
  0x89   : > { %v445_v31 = vpop.permute.xlu2 %444 }
  0x8a   : > { %v456_v47 = vmul.f32 %v445_v31, %v397_v42 }
  0x91   : > { %v450_v45 = vpop.permute.xlu2 %449 }
  0x92   : > { %v457_v49 = vmul.f32 %v450_v45, %v398_v46 }
  0xa0   : > { %v435_v29 = vpop.permute.xlu1 %434 }
  0xa1   : > { %v425_v30 = vpop.permute.xlu0 %424  ;;  %v454_v40 = vmul.f32 %v435_v29, %v395_v34 }
  0xa2   : > { %v452_v36 = vmul.f32 %v425_v30, %v393_v32 }
  0xa8   : > { %v440_v38 = vpop.permute.xlu1 %439 }
  0xa9   : > { %v430_v35 = vpop.permute.xlu0 %429  ;;  %v455_v43 = vmul.f32 %v440_v38, %v396_v39 }
  0xaa   : > { %v453_v37 = vmul.f32 %v430_v35, %v394_v33 }
  0xac   : > { %v458_v41 = vadd.f32 %v453_v37, %v452_v36 }
  0xae   : > { %v459_v44 = vadd.f32 %v458_v41, %v454_v40 }
  0xb0   : > { %v460_v48 = vadd.f32 %v459_v44, %v455_v43  ;;  %v501_v44 = vld [vmem:[%s379_s27] sm:$0x1]  ;;  %s857_s27 = scalar_lea.hbm %s1183_s7, 96 }
  0xb2   : > { %v461_v50 = vadd.f32 %v460_v48, %v456_v47 }
  0xb4   : > { %v462_v51 = vadd.f32 %v461_v50, %v457_v49  ;;  %v800_v49 = vld [vmem:[%s382_s16] ss:$0 sm:$0xff]  ;;  %s591_s16 = sshll.u32 %s588_s23, 4  ;;  %s592_s16 = int_to_ptr.hbm [resolvable:$true] %s591_s16 }
  0xb6   : > { %v463_v52 = vrot.slane %v462_v51, 4 }
  0xb8   : > { %v464_v53 = vadd.f32 %v463_v52, %v462_v51 }
  0xba   : > { %v465_v54 = vrot.slane %v464_v53, 2 }
  0xbc   : > { %v466_v55 = vadd.f32 %v465_v54, %v464_v53 }
  0xbe   : > { %v467_v56 = vrot.slane %v466_v55, 1 }
  0xc0   : > { %v468_v58 = vadd.f32 %v467_v56, %v466_v55 }
  0xc2   : > { %v470_v59 = vmul.f32 %v469_v57, %v468_v58 }
  0xc4   : > { %v1089_v60 = vsub.f32 %v393_v32, %v470_v59  ;;  %v1091_v61 = vsub.f32 %v394_v33, %v470_v59  ;;  %v1093_v62 = vsub.f32 %v395_v34, %v470_v59  ;;  %v1095_v63 = vsub.f32 %v396_v39, %v470_v59 }
  0xc5   : > { %v1097_v0 = vsub.f32 %v397_v42, %v470_v59  ;;  %v1105_v4 = vsub.f32 %v398_v46, %v470_v59  ;;  %v560_v32 = vmul.f32 0.9, %v559_v28  ;;  %v561_v33 = vmul.f32 0.1, %v470_v59 }
  0xc6   : > { %v477_v1 = vmul.f32 %v1089_v60, %v1089_v60  ;;  %v478_v2 = vmul.f32 %v1091_v61, %v1091_v61  ;;  %v479_v3 = vmul.f32 %v1093_v62, %v1093_v62  ;;  %v480_v5 = vmul.f32 %v1095_v63, %v1095_v63 }
  0xc7   : > { %v481_v8 = vmul.f32 %v1097_v0, %v1097_v0  ;;  %v482_v11 = vmul.f32 %v1105_v4, %v1105_v4  ;;  %v562_v36 = vadd.f32 %v561_v33, %v560_v32 }
  0xc8   : > { %v483_v6 = vmul.f32 %v477_v1, %v425_v30  ;;  %v484_v7 = vmul.f32 %v478_v2, %v430_v35  ;;  %v485_v9 = vmul.f32 %v479_v3, %v435_v29  ;;  %v486_v12 = vmul.f32 %v480_v5, %v440_v38 }
  0xc9   : > { %v487_v14 = vmul.f32 %v481_v8, %v445_v31  ;;  %v488_v16 = vmul.f32 %v482_v11, %v450_v45  ;;  %v564_v31 = vmul.f32 0.9, %v563_v26 }
  0xca   : > { %v489_v10 = vadd.f32 %v484_v7, %v483_v6 }
  0xcc   : > { %v490_v13 = vadd.f32 %v489_v10, %v485_v9 }
  0xce   : > { %v491_v15 = vadd.f32 %v490_v13, %v486_v12 }
  0xd0   : > { %v492_v17 = vadd.f32 %v491_v15, %v487_v14 }
  0xd2   : > { %v493_v18 = vadd.f32 %v492_v17, %v488_v16 }
  0xd4   : > { %v494_v19 = vrot.slane %v493_v18, 4 }
  0xd6   : > { %v495_v20 = vadd.f32 %v494_v19, %v493_v18 }
  0xd8   : > { %v496_v21 = vrot.slane %v495_v20, 2 }
  0xda   : > { %v497_v22 = vadd.f32 %v496_v21, %v495_v20 }
  0xdc   : > { %v498_v23 = vrot.slane %v497_v22, 1 }
  0xde   : > { %v499_v24 = vadd.f32 %v498_v23, %v497_v22 }
  0xe0   : > { %v500_v27 = vmul.f32 %v499_v24, %v469_v57 }
  0xe2   : > { %v502_v29 = vadd.f32 1e-05, %v500_v27  ;;  %v558_v30 = vmul.f32 %v557_v25, %v500_v27 }
  0xe4   : > { %805 = vrsqrt.f32 %v502_v29  ;;  %v565_v34 = vmul.f32 0.1, %v558_v30  ;;  %vm509_vm10 = vweird.f32 %v502_v29 }
  0xe6   : > { %v566_v35 = vadd.f32 %v565_v34, %v564_v31 }
  0xe8   : > { %v568_v37 = vperm.slane %v566_v35, 0 }
  0xea   : > { %v806_v38 = vpop.eup %805  ;;  %v571_v39 = vsel %vm570_vm8, %v562_v36, %v568_v37 }
  0xeb   : > { %v504_v40 = vmul.f32 %v806_v38, %v502_v29  ;;  %572 = vst [vmem:[%s392_s20] sm:$0x3] %v571_v39  ;;  %vm510_vm9 = vweird.f32 %v806_v38  ;;  %s851_s20 = sshra.s32 %s592_s16, 4  ;;  %s852_s20 = int_to_ptr.hbm [resolvable:$true] %s851_s20 }
  0xec   : > { %vm511_vm11 = vmor %vm509_vm10, %vm510_vm9  ;;  %s853_s19 = scalar_lea.hbm %s852_s20, 48  ;;  %p858_p4 = scmp.lt.s32.totalorder %s852_s20, %s1183_s7 }
  0xed   : > { %v505_v41 = vmul.f32 %v806_v38, %v504_v40  ;;  %p854_p13 = scmp.ne.s32.totalorder %s852_s20, %s853_s19  ;;  %p859_p5 = scmp.lt.s32.totalorder %s857_s27, %s853_s19 }
  0xef   : > { %v506_v42 = vmul.f32 0.5, %v505_v41  ;;  %p855_p0 = pnand %p854_p13, %p1006_p11  ;;  %p860_p7 = por %p859_p5, %p858_p4 }
  0xf1   : > { %v507_v43 = vsub.f32 1.5, %v506_v42  ;;  %p856_p3 = pneg %p855_p0 }
  0xf3   : > { %v508_v45 = vmul.f32 %v806_v38, %v507_v43  ;;  %p861_p8 = pnand %p860_p7, %p856_p3 }
  0xf5   : > { %v512_v46 = vsel %vm511_vm11, %v806_v38, %v508_v45 }
  0xf6   : > { %v513_v47 = vmul.f32 %v512_v46, %v501_v44 }
  0xf8   : > { %v515_v48 = vperm.slane %v513_v47, 0 }
  0xfa   : > { %v517_v50 = vmul.f32 %v515_v48, %v1089_v60  ;;  %v518_v51 = vmul.f32 %v515_v48, %v1091_v61  ;;  %v519_v52 = vmul.f32 %v515_v48, %v1093_v62  ;;  %v520_v53 = vmul.f32 %v515_v48, %v1095_v63 }
  0xfb   : > { %v521_v54 = vmul.f32 %v515_v48, %v1097_v0  ;;  %v522_v55 = vmul.f32 %v515_v48, %v1105_v4 }
  0xfc   : > { %v527_v56 = vadd.f32 %v800_v49, %v517_v50  ;;  %v528_v57 = vadd.f32 %v800_v49, %v518_v51  ;;  %v529_v58 = vadd.f32 %v800_v49, %v519_v52  ;;  %v530_v59 = vadd.f32 %v800_v49, %v520_v53 }
  0xfd   : > { %v531_v60 = vadd.f32 %v800_v49, %v521_v54  ;;  %v532_v61 = vadd.f32 %v800_v49, %v522_v55 }
  0xfe   : > { %533 = vst [vmem:[%s370_s0] sm:$0xff] %v527_v56 }
  0xff   : > { %534 = vst [vmem:[%s370_s0 + $0x8] sm:$0xff] %v528_v57 }
 0x100   : > { %535 = vst [vmem:[%s370_s0 + $0x10] sm:$0xff] %v529_v58 }
 0x101   : > { %536 = vst [vmem:[%s370_s0 + $0x18] sm:$0xff] %v530_v59 }
 0x102   : > { %537 = vst [vmem:[%s370_s0 + $0x20] sm:$0xff] %v531_v60 }
 0x103   : > { %538 = vst [vmem:[%s370_s0 + $0x28] sm:$0xff] %v532_v61 }
 0x104   : > { %864 = shalt.err (!%p861_p8)
}
 0x105   : > { %s909_s15 = smov 128   ;;  %s910_s11 = smov 256  }
 0x106   : > { %s911_s22 = smov 8  }
 0x107   : > { %746 = dma.vmem_to_hbm [thread:$0]  (%p1006_p11), %s590_s14, 768, %s592_s16, %s574_s24, %s909_s15, %s910_s11, %s911_s22  }
 0x108 PF: > { %s609_s25 = sand.u32 1, %s891_s29   ;;  %p753_p10 = pnand %p730_p9, %p1010_p12 }
 0x109   : > { %s610_s23 = scalar_lea.sflag [#allocation5], %s609_s25 }
 0x10a   : > { %p754_p1 = pneg %p753_p10 }
 0x10c   : > { %886 = dma.done.wait (%p754_p1), %s610_s23, 768  }
 0x10d   : > { %888 = vsyncadd (%p754_p1), %s610_s23, 4294966528  ;;  %s1190_s0 = sld [smem:[#allocation9_spill]]  ;;  %p23_p2 = scmp.ge.s32.totalorder %s985_s12, 4  }
 0x10e   : > { %s1191_s29 = smov %s895_s30  ;;  %s1192_s30 = smov %s899_s9 }
 0x10f   : > { %s1194_s10 = smov %s985_s12  ;;  %25 = sbr.rel (!%p23_p2) target bundleno = 7 (0x7), region = 117 }
 0x113   : > { %s1193_s9 = smov %s1190_s0 }
 0x114   :  { %623 = vsyncpa [#allocation4], 1 }
 0x115   :  { %625 = vsyncpa [#allocation4 + $0x1], 1 }
 0x116   :  { %626 = vsyncpa [#allocation5], 1 }
 0x117   :  { %628 = vsyncpa [#allocation5 + $0x1], 1 }

</bundles_post_ra>
